<compile_context>
chip_gen: v7x
topology: tpu7x:2x2x1
jax: 0.10.0
libtpu: 0.0.40
codegen_flags: <defaults>
</compile_context>

<pallas_src>
import functools

import jax
import jax.numpy as jnp
from jax.experimental import pallas as pl
from jax.experimental.pallas import tpu as pltpu

LANE = 128  # TPU lane width; logits padded to this for lane-dense stores


def _round_up(x, m):
    return (x + m - 1) // m * m


def bert_head_kernel(cls_ref, w1_ref, b1_ref, w2_ref, b2_ref, out_ref,
                     *, num_classes):
    # cls_ref: (TM, 768) f32      w1_ref: (768, 512)  bf16   b1_ref: (1, 512)  f32
    # w2_ref:  (512, LANE) bf16   b2_ref: (1, LANE)   f32    out_ref: (TM, LANE) f32
    x = cls_ref[...].astype(jnp.bfloat16)

    # fc1 + ReLU: bf16 MXU matmul, f32 accumulation; bias add / ReLU in f32.
    h = jnp.dot(x, w1_ref[...], preferred_element_type=jnp.float32) + b1_ref[...]
    h = jnp.maximum(h, 0.0)

    # fc2 on lane-padded (LANE-wide) weights -> (TM, LANE) logits.
    logits = jnp.dot(h.astype(jnp.bfloat16), w2_ref[...],
                     preferred_element_type=jnp.float32) + b2_ref[...]

    # Mask padded logit columns so the log-softmax normalizer only sees the
    # real num_classes logits (MUST be a huge negative, not 0).
    col = jax.lax.broadcasted_iota(jnp.int32, logits.shape, dimension=1)
    logits = jnp.where(col < num_classes, logits, -1e30)

    # Numerically stable LogSoftmax over dim=1 (f32, EUP/XLU slots).
    m = jnp.max(logits, axis=-1, keepdims=True)
    z = logits - m
    lse = jnp.log(jnp.sum(jnp.exp(z), axis=-1, keepdims=True))
    out_ref[...] = z - lse


def bert_arch_head(cls_hs, w1, b1, w2, b2, *, block_m=256):
    """Pallas forward of the BERT_Arch head.

    cls_hs: (B, 768) f32 pooled CLS hidden states.
    w1: (768, 512), b1: (1, 512), w2: (512, 2), b2: (1, 2).
    Returns (B, 2) f32 log-probabilities.
    """
    B, d_in = cls_hs.shape
    d_hid = w1.shape[1]
    num_classes = w2.shape[1]

    # Batch tile: pad B to a sublane multiple, cap at block_m, pad the batch
    # so the grid divides evenly.  Weight index_maps always return block
    # (0, 0) so W1/W2/biases stay VMEM-resident across all grid steps.
    tm = min(block_m, _round_up(B, 8))
    b_pad = _round_up(B, tm)
    if b_pad != B:
        cls_hs = jnp.pad(cls_hs, ((0, b_pad - B), (0, 0)))

    # bf16 weights for the MXU path (halves the dominant W1 DMA); biases f32.
    w1_bf16 = w1.astype(jnp.bfloat16)
    w2_pad = jnp.pad(w2, ((0, 0), (0, LANE - num_classes))).astype(jnp.bfloat16)
    b2_pad = jnp.pad(b2, ((0, 0), (0, LANE - num_classes)))

    grid = (b_pad // tm,)
    out = pl.pallas_call(
        functools.partial(bert_head_kernel, num_classes=num_classes),
        out_shape=jax.ShapeDtypeStruct((b_pad, LANE), jnp.float32),
        grid=grid,
        in_specs=[
            pl.BlockSpec((tm, d_in), lambda i: (i, 0)),       # cls tile
            pl.BlockSpec((d_in, d_hid), lambda i: (0, 0)),    # W1 (resident)
            pl.BlockSpec((1, d_hid), lambda i: (0, 0)),       # b1 (resident)
            pl.BlockSpec((d_hid, LANE), lambda i: (0, 0)),    # W2 (resident)
            pl.BlockSpec((1, LANE), lambda i: (0, 0)),        # b2 (resident)
        ],
        out_specs=pl.BlockSpec((tm, LANE), lambda i: (i, 0)),
        compiler_params=pltpu.CompilerParams(
            dimension_semantics=("parallel",)),
    )(cls_hs, w1_bf16, b1, w2_pad, b2_pad)

    return out[:B, :num_classes]


def _reference_f32(cls_hs, w1, b1, w2, b2):
    h = jnp.maximum(cls_hs @ w1 + b1, 0.0)
    logits = h @ w2 + b2
    return jax.nn.log_softmax(logits, axis=1)


def _reference_bf16(cls_hs, w1, b1, w2, b2):
    # Same bf16-matmul / f32-accumulate math the kernel performs.
    h = jnp.dot(cls_hs.astype(jnp.bfloat16), w1.astype(jnp.bfloat16),
                preferred_element_type=jnp.float32) + b1
    h = jnp.maximum(h, 0.0)
    logits = jnp.dot(h.astype(jnp.bfloat16), w2.astype(jnp.bfloat16),
                     preferred_element_type=jnp.float32) + b2
    return jax.nn.log_softmax(logits, axis=1)


if __name__ == "__main__":
    key = jax.random.PRNGKey(0)
    k_cls, k_w1, k_b1, k_w2, k_b2 = jax.random.split(key, 5)

    B, D_IN, D_HID, D_OUT = 8, 768, 512, 2

    # Pooled CLS hidden states standing in for the BERT encoder output.
    cls_hs = jax.random.normal(k_cls, (B, D_IN), dtype=jnp.float32)

    # Deterministic parameter init (PyTorch-style uniform +-1/sqrt(fan_in)).
    lim1 = 1.0 / jnp.sqrt(float(D_IN))
    lim2 = 1.0 / jnp.sqrt(float(D_HID))
    w1 = jax.random.uniform(k_w1, (D_IN, D_HID), jnp.float32, -lim1, lim1)
    b1 = jax.random.uniform(k_b1, (1, D_HID), jnp.float32, -lim1, lim1)
    w2 = jax.random.uniform(k_w2, (D_HID, D_OUT), jnp.float32, -lim2, lim2)
    b2 = jax.random.uniform(k_b2, (1, D_OUT), jnp.float32, -lim2, lim2)

    out = bert_arch_head(cls_hs, w1, b1, w2, b2)
    out = jax.block_until_ready(out)
    assert out.shape == (B, D_OUT)

    # Tight check vs. a reference doing the same bf16-matmul math.
    ref_bf16 = _reference_bf16(cls_hs, w1, b1, w2, b2)
    assert jnp.allclose(out, ref_bf16, atol=1e-4, rtol=1e-4)

    # Loose sanity check vs. the pure-f32 PyTorch-semantics reference.
    ref_f32 = _reference_f32(cls_hs, w1, b1, w2, b2)
    assert jnp.allclose(out, ref_f32, atol=3e-2, rtol=3e-2)

    print("KERNEL_OK")
</pallas_src>

<mosaic_0001>
module attributes {stable_mosaic.version = 11 : i64} {
  func.func @bert_head_kernel(%arg0: i32, %arg1: memref<8x768xf32, #tpu.memory_space<vmem>>, %arg2: memref<768x512xbf16, #tpu.memory_space<vmem>>, %arg3: memref<1x512xf32, #tpu.memory_space<vmem>>, %arg4: memref<512x128xbf16, #tpu.memory_space<vmem>>, %arg5: memref<1x128xf32, #tpu.memory_space<vmem>>, %arg6: memref<8x128xf32, #tpu.memory_space<vmem>>) attributes {dimension_semantics = [#tpu.dimension_semantics<parallel>], iteration_bounds = array<i64: 1>, scalar_prefetch = 0 : i64, scratch_operands = 0 : i64, tpu.core_type = #tpu.core_type<tc>, window_params = [{transform_indices = @transform_0, window_bounds = array<i64: 8, 768>}, {pipeline_mode = #tpu.pipeline_mode<synchronous>, transform_indices = @transform_1, window_bounds = array<i64: 768, 512>}, {pipeline_mode = #tpu.pipeline_mode<synchronous>, transform_indices = @transform_2, window_bounds = array<i64: 1, 512>}, {pipeline_mode = #tpu.pipeline_mode<synchronous>, transform_indices = @transform_3, window_bounds = array<i64: 512, 128>}, {pipeline_mode = #tpu.pipeline_mode<synchronous>, transform_indices = @transform_4, window_bounds = array<i64: 1, 128>}, {transform_indices = @transform_5, window_bounds = array<i64: 8, 128>}]} {
    %c0 = arith.constant 0 : index
    %c0_0 = arith.constant 0 : index
    %0 = vector.load %arg1[%c0, %c0_0] : memref<8x768xf32, #tpu.memory_space<vmem>>, vector<8x768xf32>
    %1 = arith.truncf %0 : vector<8x768xf32> to vector<8x768xbf16>
    %c0_1 = arith.constant 0 : index
    %c0_2 = arith.constant 0 : index
    %2 = vector.load %arg2[%c0_1, %c0_2] : memref<768x512xbf16, #tpu.memory_space<vmem>>, vector<768x512xbf16>
    %cst = arith.constant dense<0.000000e+00> : vector<8x512xf32>
    %3 = tpu.matmul %1, %2, %cst {dimension_numbers = #tpu.dot_dimension_numbers<[1], [0], [0], [1], [0, 0, 1, 1], [], []>} : vector<8x768xbf16>, vector<768x512xbf16>, vector<8x512xf32> -> vector<8x512xf32>
    %c0_3 = arith.constant 0 : index
    %c0_4 = arith.constant 0 : index
    %4 = vector.load %arg3[%c0_3, %c0_4] : memref<1x512xf32, #tpu.memory_space<vmem>>, vector<1x512xf32>
    %5 = vector.broadcast %4 : vector<1x512xf32> to vector<8x512xf32>
    %6 = arith.addf %3, %5 : vector<8x512xf32>
    %cst_5 = arith.constant 0.000000e+00 : f32
    %7 = vector.broadcast %cst_5 : f32 to vector<8x512xf32>
    %8 = arith.maximumf %6, %7 : vector<8x512xf32>
    %9 = arith.truncf %8 : vector<8x512xf32> to vector<8x512xbf16>
    %c0_6 = arith.constant 0 : index
    %c0_7 = arith.constant 0 : index
    %10 = vector.load %arg4[%c0_6, %c0_7] : memref<512x128xbf16, #tpu.memory_space<vmem>>, vector<512x128xbf16>
    %cst_8 = arith.constant dense<0.000000e+00> : vector<8x128xf32>
    %11 = tpu.matmul %9, %10, %cst_8 {dimension_numbers = #tpu.dot_dimension_numbers<[1], [0], [0], [1], [0, 0, 1, 1], [], []>} : vector<8x512xbf16>, vector<512x128xbf16>, vector<8x128xf32> -> vector<8x128xf32>
    %c0_9 = arith.constant 0 : index
    %c0_10 = arith.constant 0 : index
    %12 = vector.load %arg5[%c0_9, %c0_10] : memref<1x128xf32, #tpu.memory_space<vmem>>, vector<1x128xf32>
    %13 = vector.broadcast %12 : vector<1x128xf32> to vector<8x128xf32>
    %14 = arith.addf %11, %13 : vector<8x128xf32>
    %15 = tpu.iota {dimensions = array<i32: 1>} : vector<8x128xi32>
    %c2_i32 = arith.constant 2 : i32
    %16 = vector.broadcast %c2_i32 : i32 to vector<8x128xi32>
    %17 = arith.cmpi slt, %15, %16 : vector<8x128xi32>
    %cst_11 = arith.constant -1.000000e+30 : f32
    %18 = vector.broadcast %cst_11 : f32 to vector<8x128xf32>
    %19 = arith.select %17, %14, %18 : vector<8x128xi1>, vector<8x128xf32>
    %cst_12 = arith.constant dense<0xFF800000> : vector<8xf32>
    %20 = vector.multi_reduction <maximumf>, %19, %cst_12 [1] : vector<8x128xf32> to vector<8xf32>
    %21 = vector.shape_cast %20 : vector<8xf32> to vector<8x1xf32>
    %22 = vector.broadcast %21 : vector<8x1xf32> to vector<8x128xf32>
    %23 = arith.subf %19, %22 : vector<8x128xf32>
    %24 = math.exp %23 : vector<8x128xf32>
    %cst_13 = arith.constant dense<0.000000e+00> : vector<8xf32>
    %25 = vector.multi_reduction <add>, %24, %cst_13 [1] : vector<8x128xf32> to vector<8xf32>
    %26 = vector.shape_cast %25 : vector<8xf32> to vector<8x1xf32>
    %27 = math.log %26 : vector<8x1xf32>
    %28 = vector.broadcast %27 : vector<8x1xf32> to vector<8x128xf32>
    %29 = arith.subf %23, %28 : vector<8x128xf32>
    %c0_14 = arith.constant 0 : index
    %c0_15 = arith.constant 0 : index
    %30 = vector.load %arg6[%c0_14, %c0_15] : memref<8x128xf32, #tpu.memory_space<vmem>>, vector<8x128xf32>
    tpu.vector_store %arg6[%c0_14, %c0_15], %29 {strides = array<i32>} : memref<8x128xf32, #tpu.memory_space<vmem>>, vector<8x128xf32>,
    return
  }
  func.func @transform_0(%arg0: i32) -> (i32, i32) {
    %c0_i32 = arith.constant 0 : i32
    %c0_i32_0 = arith.constant 0 : i32
    return %arg0, %c0_i32 : i32, i32
  }
  func.func @transform_1(%arg0: i32) -> (i32, i32) {
    %c0_i32 = arith.constant 0 : i32
    %c0_i32_0 = arith.constant 0 : i32
    %c0_i32_1 = arith.constant 0 : i32
    return %c0_i32, %c0_i32_0 : i32, i32
  }
  func.func @transform_2(%arg0: i32) -> (i32, i32) {
    %c0_i32 = arith.constant 0 : i32
    %c0_i32_0 = arith.constant 0 : i32
    %c0_i32_1 = arith.constant 0 : i32
    return %c0_i32, %c0_i32_0 : i32, i32
  }
  func.func @transform_3(%arg0: i32) -> (i32, i32) {
    %c0_i32 = arith.constant 0 : i32
    %c0_i32_0 = arith.constant 0 : i32
    %c0_i32_1 = arith.constant 0 : i32
    return %c0_i32, %c0_i32_0 : i32, i32
  }
  func.func @transform_4(%arg0: i32) -> (i32, i32) {
    %c0_i32 = arith.constant 0 : i32
    %c0_i32_0 = arith.constant 0 : i32
    %c0_i32_1 = arith.constant 0 : i32
    return %c0_i32, %c0_i32_0 : i32, i32
  }
  func.func @transform_5(%arg0: i32) -> (i32, i32) {
    %c0_i32 = arith.constant 0 : i32
    %c0_i32_0 = arith.constant 0 : i32
    return %arg0, %c0_i32 : i32, i32
  }
}

</mosaic_0001>

<bundles_post_ra>
// kernel: tpu_custom_call.1
= control target key start
LH: loop header
LB: loop body
LE: loop exit
PB: predicated region body
PF: predicated region fallthrough
CT: control target
= control target key end

     0   :  { %10 = vsyncpa [#allocation3], 0  ;;  %s2682_s0 = inlined_call_operand.hbm [shape: f32[8,768], index: 0, kind: input, shape index: {}]   ;;  %s2683_s1 = inlined_call_operand.hbm [shape: bf16[768,512], index: 1, kind: input, shape index: {}]   ;;  %s2684_s2 = inlined_call_operand.vmem [shape: f32[1,512], index: 2, kind: input, shape index: {}]   ;;  %s2685_s3 = inlined_call_operand.hbm [shape: bf16[512,128], index: 3, kind: input, shape index: {}]   ;;  %s2686_s4 = inlined_call_operand.vmem [shape: f32[1,128], index: 4, kind: input, shape index: {}]   ;;  %s2687_s5 = inlined_call_operand.hbm [shape: f32[8,128], index: 5, kind: output, shape index: {}]  }
   0x1   :  { %11 = vsyncpa [#allocation6], 0 }
   0x2   :  { %12 = vsyncpa [#allocation4], 0  ;;  %s2590_s18 = smov [#allocation5]   ;;  %s2496_s22 = scalar_lea.hbm %s2683_s1, 24576 }
   0x3   :  { %s28_s19 = sshll.u32 %s2590_s18, 4  ;;  %p2497_p0 = scmp.ne.s32.totalorder %s2683_s1, %s2496_s22  ;;  %s29_s19 = int_to_ptr.vmem [resolvable:$true] %s28_s19 }
   0x4   :  { %p2500_p1 = scmp.lt.u32.totalorder %s2496_s22, %s2683_s1 }
   0x6   :  { %p2502_p2 = pnand %p2500_p1, %p2497_p0 }
   0x8   :  { %2505 = shalt.err (!%p2502_p2)
}
   0x9   :  { %s2506_s27 = scalar_lea.vmem %s29_s19, 24576  ;;  %p2511_p4 = scmp.lt.s32.totalorder %s29_s19, %s29_s19 }
   0xa   :  { %p2507_p3 = scmp.ne.s32.totalorder %s29_s19, %s2506_s27  ;;  %p2512_p5 = scmp.lt.s32.totalorder %s2506_s27, %s2506_s27 }
   0xc   :  { %p2513_p6 = por %p2512_p5, %p2511_p4 }
   0xe   :  { %p2514_p7 = pnand %p2513_p6, %p2507_p3 }
  0x10   :  { %2517 = shalt.err (!%p2514_p7)
}
  0x11   :  { %s2591_s28 = smov 256   ;;  %s2592_s29 = smov 16  }
  0x12   :  { %34 = dma.hbm_to_vmem [thread:$0]  %s2683_s1, 24576, %s29_s19, [#allocation6], %s2591_s28, %s2591_s28, %s2592_s29  }
  0x13   :  { %s2593_s7 = smov [#allocation2]   ;;  %s2594_s9 = smov [#allocation7]  }
  0x14   :  { %s19_s8 = sshll.u32 %s2593_s7, 4  ;;  %s42_s10 = sshll.u32 %s2594_s9, 4  ;;  %s20_s8 = int_to_ptr.vmem [resolvable:$true] %s19_s8  ;;  %s43_s10 = int_to_ptr.vmem [resolvable:$true] %s42_s10 }
  0x15   :  { %s2518_s13 = scalar_lea.hbm %s2682_s0, 768 }
  0x16   :  { %p2519_p8 = scmp.ne.s32.totalorder %s2682_s0, %s2518_s13  ;;  %p2522_p9 = scmp.lt.u32.totalorder %s2518_s13, %s2682_s0 }
  0x18   :  { %p2524_p10 = pnand %p2522_p9, %p2519_p8 }
  0x1a   :  { %2527 = shalt.err (!%p2524_p10)
}
  0x1b   :  { %s2528_s1 = scalar_lea.vmem %s20_s8, 768  ;;  %p2533_p12 = scmp.lt.s32.totalorder %s20_s8, %s20_s8 }
  0x1c   :  { %p2529_p11 = scmp.ne.s32.totalorder %s20_s8, %s2528_s1  ;;  %p2534_p13 = scmp.lt.s32.totalorder %s2528_s1, %s2528_s1 }
  0x1e   :  { %p2535_p0 = por %p2534_p13, %p2533_p12 }
  0x20   :  { %p2536_p1 = pnand %p2535_p0, %p2529_p11 }
  0x22   :  { %2539 = shalt.err (!%p2536_p1)
}
  0x23   :  { %22 = dma.hbm_to_vmem [thread:$0]  %s2682_s0, 768, %s20_s8, [#allocation3]  }
  0x24   :  { %s2540_s22 = scalar_lea.hbm %s2685_s3, 4096 }
  0x25   :  { %p2541_p2 = scmp.ne.s32.totalorder %s2685_s3, %s2540_s22  ;;  %p2544_p3 = scmp.lt.u32.totalorder %s2540_s22, %s2685_s3 }
  0x27   :  { %p2546_p4 = pnand %p2544_p3, %p2541_p2 }
  0x29   :  { %2549 = shalt.err (!%p2546_p4)
}
  0x2a   :  { %s2550_s27 = scalar_lea.vmem %s43_s10, 4096  ;;  %p2555_p6 = scmp.lt.s32.totalorder %s43_s10, %s43_s10 }
  0x2b   :  { %p2551_p5 = scmp.ne.s32.totalorder %s43_s10, %s2550_s27  ;;  %p2556_p7 = scmp.lt.s32.totalorder %s2550_s27, %s2550_s27 }
  0x2d   :  { %p2557_p8 = por %p2556_p7, %p2555_p6 }
  0x2f   :  { %p2558_p9 = pnand %p2557_p8, %p2551_p5 }
  0x31   :  { %2561 = shalt.err (!%p2558_p9)
}
  0x32   :  { %s2595_s0 = smov 64   ;;  %s2596_s28 = smov 4  }
  0x33   :  { %48 = dma.hbm_to_vmem [thread:$0]  %s2685_s3, 4096, %s43_s10, [#allocation6], %s2595_s0, %s2595_s0, %s2596_s28  }
  0x34   :  { %2584 = dma.done.wait [#allocation3], 768  }
  0x35   :  { %2585 = vsyncadd [#allocation3], 4294966528 }
  0x36   :  { %2586 = dma.done.wait [#allocation6], 28672  }
  0x37   :  { %2587 = vsyncadd [#allocation6], 4294938624  ;;  %v2172_v0 = vld [vmem:[#allocation5 + $0x4] ss:$16 sps:$4 sm:$0xff]   ;;  %v2174_v1 = vld [vmem:[#allocation5 + $0xc] ss:$16 sps:$4 sm:$0xff]  }
  0x38   :  { %1247 = vmatprep.subr.bf16.mxu0 %v2172_v0  ;;  %v2176_v2 = vld [vmem:[#allocation5] ss:$16 sps:$4 sm:$0xff]   ;;  %v2177_v3 = vld [vmem:[#allocation5 + $0x8] ss:$16 sps:$4 sm:$0xff]   ;;  %1370 = vmatprep.subr.bf16.mxu1 %v2174_v1  ;;  %v2178_v4 = vld [vmem:[#allocation5 + $0x24] ss:$16 sps:$4 sm:$0xff]  }
  0x39   :  { %1248 = vmatpush1.bf16.msra.mxu0 %v2176_v2  ;;  %1371 = vmatpush1.bf16.msra.mxu1 %v2177_v3  ;;  %v2180_v5 = vld [vmem:[#allocation5 + $0x2c] ss:$16 sps:$4 sm:$0xff]   ;;  %v2182_v6 = vld [vmem:[#allocation5 + $0x20] ss:$16 sps:$4 sm:$0xff]   ;;  %v2183_v7 = vld [vmem:[#allocation5 + $0x28] ss:$16 sps:$4 sm:$0xff]  }
  0x3a   :  { %1249 = vmatprep.subr.bf16.mxu0 %v2178_v4  ;;  %1372 = vmatprep.subr.bf16.mxu1 %v2180_v5  ;;  %v2184_v8 = vld [vmem:[#allocation5 + $0x44] ss:$16 sps:$4 sm:$0xff]   ;;  %v2186_v9 = vld [vmem:[#allocation5 + $0x4c] ss:$16 sps:$4 sm:$0xff]   ;;  %v2188_v10 = vld [vmem:[#allocation5 + $0x40] ss:$16 sps:$4 sm:$0xff]  }
  0x3b   :  { %v2189_v11 = vld [vmem:[#allocation5 + $0x48] ss:$16 sps:$4 sm:$0xff]   ;;  %v2190_v12 = vld [vmem:[#allocation5 + $0x64] ss:$16 sps:$4 sm:$0xff]   ;;  %v2192_v13 = vld [vmem:[#allocation5 + $0x6c] ss:$16 sps:$4 sm:$0xff]  }
  0x3c   :  { %v2194_v14 = vld [vmem:[#allocation5 + $0x60] ss:$16 sps:$4 sm:$0xff]   ;;  %v2195_v15 = vld [vmem:[#allocation5 + $0x68] ss:$16 sps:$4 sm:$0xff]   ;;  %v2196_v16 = vld [vmem:[#allocation5 + $0x84] ss:$16 sps:$4 sm:$0xff]  }
  0x3d   :  { %1250 = vmatpush1.bf16.msra.mxu0 %v2182_v6  ;;  %1373 = vmatpush1.bf16.msra.mxu1 %v2183_v7  ;;  %v2198_v17 = vld [vmem:[#allocation5 + $0x8c] ss:$16 sps:$4 sm:$0xff]   ;;  %v2200_v18 = vld [vmem:[#allocation5 + $0x80] ss:$16 sps:$4 sm:$0xff]   ;;  %v2201_v19 = vld [vmem:[#allocation5 + $0x88] ss:$16 sps:$4 sm:$0xff]  }
  0x3e   :  { %1251 = vmatprep.subr.bf16.mxu0 %v2184_v8  ;;  %1374 = vmatprep.subr.bf16.mxu1 %v2186_v9  ;;  %v2202_v20 = vld [vmem:[#allocation5 + $0xa4] ss:$16 sps:$4 sm:$0xff]   ;;  %v2204_v21 = vld [vmem:[#allocation5 + $0xac] ss:$16 sps:$4 sm:$0xff]   ;;  %v2206_v22 = vld [vmem:[#allocation5 + $0xa0] ss:$16 sps:$4 sm:$0xff]  }
  0x3f   :  { %v2207_v23 = vld [vmem:[#allocation5 + $0xa8] ss:$16 sps:$4 sm:$0xff]   ;;  %v2208_v24 = vld [vmem:[#allocation5 + $0xc4] ss:$16 sps:$4 sm:$0xff]   ;;  %v2210_v25 = vld [vmem:[#allocation5 + $0xcc] ss:$16 sps:$4 sm:$0xff]  }
  0x40   :  { %v2212_v26 = vld [vmem:[#allocation5 + $0xc0] ss:$16 sps:$4 sm:$0xff]   ;;  %v2213_v27 = vld [vmem:[#allocation5 + $0xc8] ss:$16 sps:$4 sm:$0xff]   ;;  %v2214_v28 = vld [vmem:[#allocation5 + $0xe4] ss:$16 sps:$4 sm:$0xff]  }
  0x41   :  { %1252 = vmatpush1.bf16.msra.mxu0 %v2188_v10  ;;  %1375 = vmatpush1.bf16.msra.mxu1 %v2189_v11  ;;  %v2216_v29 = vld [vmem:[#allocation5 + $0xec] ss:$16 sps:$4 sm:$0xff]   ;;  %v2218_v30 = vld [vmem:[#allocation5 + $0xe0] ss:$16 sps:$4 sm:$0xff]   ;;  %v2219_v31 = vld [vmem:[#allocation5 + $0xe8] ss:$16 sps:$4 sm:$0xff]  }
  0x42   :  { %1253 = vmatprep.subr.bf16.mxu0 %v2190_v12  ;;  %1376 = vmatprep.subr.bf16.mxu1 %v2192_v13  ;;  %v2220_v32 = vld [vmem:[#allocation5 + $0x104] ss:$16 sps:$4 sm:$0xff]   ;;  %v2222_v33 = vld [vmem:[#allocation5 + $0x10c] ss:$16 sps:$4 sm:$0xff]   ;;  %v2224_v34 = vld [vmem:[#allocation5 + $0x100] ss:$16 sps:$4 sm:$0xff]  }
  0x43   :  { %v2225_v35 = vld [vmem:[#allocation5 + $0x108] ss:$16 sps:$4 sm:$0xff]   ;;  %v2226_v36 = vld [vmem:[#allocation5 + $0x124] ss:$16 sps:$4 sm:$0xff]   ;;  %v2228_v37 = vld [vmem:[#allocation5 + $0x12c] ss:$16 sps:$4 sm:$0xff]  }
  0x44   :  { %v2230_v38 = vld [vmem:[#allocation5 + $0x120] ss:$16 sps:$4 sm:$0xff]   ;;  %v2231_v39 = vld [vmem:[#allocation5 + $0x128] ss:$16 sps:$4 sm:$0xff]   ;;  %v2232_v40 = vld [vmem:[#allocation5 + $0x144] ss:$16 sps:$4 sm:$0xff]  }
  0x45   :  { %1254 = vmatpush1.bf16.msra.mxu0 %v2194_v14  ;;  %1377 = vmatpush1.bf16.msra.mxu1 %v2195_v15  ;;  %v2234_v41 = vld [vmem:[#allocation5 + $0x14c] ss:$16 sps:$4 sm:$0xff]   ;;  %v2236_v42 = vld [vmem:[#allocation5 + $0x140] ss:$16 sps:$4 sm:$0xff]   ;;  %v2237_v43 = vld [vmem:[#allocation5 + $0x148] ss:$16 sps:$4 sm:$0xff]  }
  0x46   :  { %1255 = vmatprep.subr.bf16.mxu0 %v2196_v16  ;;  %1378 = vmatprep.subr.bf16.mxu1 %v2198_v17  ;;  %v2238_v44 = vld [vmem:[#allocation5 + $0x164] ss:$16 sps:$4 sm:$0xff]   ;;  %v2240_v45 = vld [vmem:[#allocation5 + $0x16c] ss:$16 sps:$4 sm:$0xff]   ;;  %v2242_v47 = vld [vmem:[#allocation5 + $0x160] ss:$16 sps:$4 sm:$0xff]  }
  0x47   :  { %v62_v46 = vld [vmem:[#allocation2 + $0x8] sm:$0xff]  ;;  %v2244_v50 = vld [vmem:[#allocation5 + $0x184] ss:$16 sps:$4 sm:$0xff]   ;;  %v2248_v52 = vld [vmem:[#allocation5 + $0x180] ss:$16 sps:$4 sm:$0xff]  }
  0x48   :  { %v68_v48 = vpack.c.bf16 %v62_v46, %v62_v46  ;;  %v2243_v49 = vld [vmem:[#allocation5 + $0x168] ss:$16 sps:$4 sm:$0xff]   ;;  %v2246_v51 = vld [vmem:[#allocation5 + $0x18c] ss:$16 sps:$4 sm:$0xff]   ;;  %v2250_v54 = vld [vmem:[#allocation5 + $0x1a4] ss:$16 sps:$4 sm:$0xff]  }
  0x49   :  { %1256 = vmatpush1.bf16.msra.mxu0 %v2200_v18  ;;  %1379 = vmatpush1.bf16.msra.mxu1 %v2201_v19  ;;  %v2249_v53 = vld [vmem:[#allocation5 + $0x188] ss:$16 sps:$4 sm:$0xff]   ;;  %v2252_v55 = vld [vmem:[#allocation5 + $0x1ac] ss:$16 sps:$4 sm:$0xff]   ;;  %v2254_v56 = vld [vmem:[#allocation5 + $0x1a0] ss:$16 sps:$4 sm:$0xff]  }
  0x4a   :  { %1257 = vmatprep.subr.bf16.mxu0 %v2202_v20  ;;  %1380 = vmatprep.subr.bf16.mxu1 %v2204_v21  ;;  %v2255_v57 = vld [vmem:[#allocation5 + $0x1a8] ss:$16 sps:$4 sm:$0xff]   ;;  %v2256_v58 = vld [vmem:[#allocation5 + $0x1c4] ss:$16 sps:$4 sm:$0xff]   ;;  %v2258_v59 = vld [vmem:[#allocation5 + $0x1cc] ss:$16 sps:$4 sm:$0xff]  }
  0x4b   :  { %1279 = vmatprep.mubr.bf16.mxu0 %v68_v48  ;;  %1402 = vmatprep.mubr.bf16.mxu1 %v68_v48  ;;  %v2260_v60 = vld [vmem:[#allocation5 + $0x1c0] ss:$16 sps:$4 sm:$0xff]   ;;  %v2261_v61 = vld [vmem:[#allocation5 + $0x1c8] ss:$16 sps:$4 sm:$0xff]   ;;  %v2262_v62 = vld [vmem:[#allocation5 + $0x1e4] ss:$16 sps:$4 sm:$0xff]  }
  0x4c   :  { %v2264_v63 = vld [vmem:[#allocation5 + $0x1ec] ss:$16 sps:$4 sm:$0xff]   ;;  %v2266_v0 = vld [vmem:[#allocation5 + $0x1e0] ss:$16 sps:$4 sm:$0xff]   ;;  %v2267_v1 = vld [vmem:[#allocation5 + $0x1e8] ss:$16 sps:$4 sm:$0xff]  }
  0x4d   :  { %1258 = vmatpush1.bf16.msra.mxu0 %v2206_v22  ;;  %1381 = vmatpush1.bf16.msra.mxu1 %v2207_v23  ;;  %v61_v2 = vld [vmem:[#allocation2] sm:$0xff]  ;;  %v2273_v4 = vld [vmem:[#allocation5 + $0x20c] ss:$16 sps:$4 sm:$0xff]   ;;  %v2271_v7 = vld [vmem:[#allocation5 + $0x208] ss:$16 sps:$4 sm:$0xff]  }
  0x4e   :  { %1259 = vmatprep.subr.bf16.mxu0 %v2208_v24  ;;  %1382 = vmatprep.subr.bf16.mxu1 %v2210_v25  ;;  %v2270_v3 = vld [vmem:[#allocation5 + $0x204] ss:$16 sps:$4 sm:$0xff]   ;;  %v67_v5 = vpack.c.bf16 %v61_v2, %v61_v2  ;;  %v2268_v6 = vld [vmem:[#allocation5 + $0x200] ss:$16 sps:$4 sm:$0xff]   ;;  %v2279_v9 = vld [vmem:[#allocation5 + $0x22c] ss:$16 sps:$4 sm:$0xff]  }
  0x4f   :  { %v2276_v8 = vld [vmem:[#allocation5 + $0x224] ss:$16 sps:$4 sm:$0xff]   ;;  %v2274_v10 = vld [vmem:[#allocation5 + $0x220] ss:$16 sps:$4 sm:$0xff]   ;;  %v2277_v11 = vld [vmem:[#allocation5 + $0x228] ss:$16 sps:$4 sm:$0xff]  }
  0x50   :  { %v2282_v12 = vld [vmem:[#allocation5 + $0x244] ss:$16 sps:$4 sm:$0xff]   ;;  %v2285_v13 = vld [vmem:[#allocation5 + $0x24c] ss:$16 sps:$4 sm:$0xff]   ;;  %v2280_v14 = vld [vmem:[#allocation5 + $0x240] ss:$16 sps:$4 sm:$0xff]  }
  0x51   :  { %1260 = vmatpush1.bf16.msra.mxu0 %v2212_v26  ;;  %1383 = vmatpush1.bf16.msra.mxu1 %v2213_v27  ;;  %v2283_v15 = vld [vmem:[#allocation5 + $0x248] ss:$16 sps:$4 sm:$0xff]   ;;  %v2288_v16 = vld [vmem:[#allocation5 + $0x264] ss:$16 sps:$4 sm:$0xff]   ;;  %v2291_v17 = vld [vmem:[#allocation5 + $0x26c] ss:$16 sps:$4 sm:$0xff]  }
  0x52   :  { %1261 = vmatprep.subr.bf16.mxu0 %v2214_v28  ;;  %1384 = vmatprep.subr.bf16.mxu1 %v2216_v29  ;;  %v2286_v18 = vld [vmem:[#allocation5 + $0x260] ss:$16 sps:$4 sm:$0xff]   ;;  %v2289_v19 = vld [vmem:[#allocation5 + $0x268] ss:$16 sps:$4 sm:$0xff]   ;;  %v2294_v20 = vld [vmem:[#allocation5 + $0x284] ss:$16 sps:$4 sm:$0xff]  }
  0x53   :  { %v2297_v21 = vld [vmem:[#allocation5 + $0x28c] ss:$16 sps:$4 sm:$0xff]   ;;  %v2292_v22 = vld [vmem:[#allocation5 + $0x280] ss:$16 sps:$4 sm:$0xff]   ;;  %v2295_v23 = vld [vmem:[#allocation5 + $0x288] ss:$16 sps:$4 sm:$0xff]  }
  0x54   :  { %v2300_v24 = vld [vmem:[#allocation5 + $0x2a4] ss:$16 sps:$4 sm:$0xff]   ;;  %v2303_v25 = vld [vmem:[#allocation5 + $0x2ac] ss:$16 sps:$4 sm:$0xff]   ;;  %v2298_v26 = vld [vmem:[#allocation5 + $0x2a0] ss:$16 sps:$4 sm:$0xff]  }
  0x55   :  { %1262 = vmatpush1.bf16.msra.mxu0 %v2218_v30  ;;  %1385 = vmatpush1.bf16.msra.mxu1 %v2219_v31  ;;  %v2301_v27 = vld [vmem:[#allocation5 + $0x2a8] ss:$16 sps:$4 sm:$0xff]   ;;  %v2306_v28 = vld [vmem:[#allocation5 + $0x2c4] ss:$16 sps:$4 sm:$0xff]   ;;  %v2309_v29 = vld [vmem:[#allocation5 + $0x2cc] ss:$16 sps:$4 sm:$0xff]  }
  0x56   :  { %1263 = vmatprep.subr.bf16.mxu0 %v2220_v32  ;;  %1386 = vmatprep.subr.bf16.mxu1 %v2222_v33  ;;  %v64_v30 = vld [vmem:[#allocation2 + $0x18] sm:$0xff]  ;;  %v2304_v31 = vld [vmem:[#allocation5 + $0x2c0] ss:$16 sps:$4 sm:$0xff]   ;;  %v2330_v46 = vld [vmem:[#allocation5 + $0x344] ss:$16 sps:$4 sm:$0xff]  }
  0x57   :  { %v70_v32 = vpack.c.bf16 %v64_v30, %v64_v30  ;;  %v2307_v33 = vld [vmem:[#allocation5 + $0x2c8] ss:$16 sps:$4 sm:$0xff]   ;;  %v2328_v48 = vld [vmem:[#allocation5 + $0x340] ss:$16 sps:$4 sm:$0xff]   ;;  %v2360_v2 = vld [vmem:[#allocation5 + $0x3e4] ss:$16 sps:$4 sm:$0xff]  }
  0x58   :  { %v2396_v30 = vld [vmem:[#allocation5 + $0x4a4] ss:$16 sps:$4 sm:$0xff]  }
  0x59   :  { %1264 = vmatpush1.bf16.msra.mxu0 %v2224_v34  ;;  %1387 = vmatpush1.bf16.msra.mxu1 %v2225_v35  ;;  %v2312_v34 = vld [vmem:[#allocation5 + $0x2e4] ss:$16 sps:$4 sm:$0xff]   ;;  %v2315_v35 = vld [vmem:[#allocation5 + $0x2ec] ss:$16 sps:$4 sm:$0xff]  }
  0x5a   :  { %1265 = vmatprep.subr.bf16.mxu0 %v2226_v36  ;;  %1388 = vmatprep.subr.bf16.mxu1 %v2228_v37  ;;  %v2310_v36 = vld [vmem:[#allocation5 + $0x2e0] ss:$16 sps:$4 sm:$0xff]   ;;  %v2313_v37 = vld [vmem:[#allocation5 + $0x2e8] ss:$16 sps:$4 sm:$0xff]  }
  0x5d   :  { %1266 = vmatpush1.bf16.msra.mxu0 %v2230_v38  ;;  %1389 = vmatpush1.bf16.msra.mxu1 %v2231_v39  ;;  %v2318_v38 = vld [vmem:[#allocation5 + $0x304] ss:$16 sps:$4 sm:$0xff]   ;;  %v2321_v39 = vld [vmem:[#allocation5 + $0x30c] ss:$16 sps:$4 sm:$0xff]  }
  0x5e   :  { %1267 = vmatprep.subr.bf16.mxu0 %v2232_v40  ;;  %1390 = vmatprep.subr.bf16.mxu1 %v2234_v41  ;;  %v2316_v40 = vld [vmem:[#allocation5 + $0x300] ss:$16 sps:$4 sm:$0xff]   ;;  %v2319_v41 = vld [vmem:[#allocation5 + $0x308] ss:$16 sps:$4 sm:$0xff]  }
  0x61   :  { %1268 = vmatpush1.bf16.msra.mxu0 %v2236_v42  ;;  %1391 = vmatpush1.bf16.msra.mxu1 %v2237_v43  ;;  %v2324_v42 = vld [vmem:[#allocation5 + $0x324] ss:$16 sps:$4 sm:$0xff]   ;;  %v2327_v43 = vld [vmem:[#allocation5 + $0x32c] ss:$16 sps:$4 sm:$0xff]  }
  0x62   :  { %1269 = vmatprep.subr.bf16.mxu0 %v2238_v44  ;;  %1392 = vmatprep.subr.bf16.mxu1 %v2240_v45  ;;  %v2322_v44 = vld [vmem:[#allocation5 + $0x320] ss:$16 sps:$4 sm:$0xff]   ;;  %v2325_v45 = vld [vmem:[#allocation5 + $0x328] ss:$16 sps:$4 sm:$0xff]  }
  0x65   :  { %1270 = vmatpush1.bf16.msra.mxu0 %v2242_v47  ;;  %1393 = vmatpush1.bf16.msra.mxu1 %v2243_v49  ;;  %v2333_v47 = vld [vmem:[#allocation5 + $0x34c] ss:$16 sps:$4 sm:$0xff]   ;;  %v2331_v49 = vld [vmem:[#allocation5 + $0x348] ss:$16 sps:$4 sm:$0xff]  }
  0x66   :  { %1271 = vmatprep.subr.bf16.mxu0 %v2244_v50  ;;  %1394 = vmatprep.subr.bf16.mxu1 %v2246_v51  ;;  %v2336_v50 = vld [vmem:[#allocation5 + $0x364] ss:$16 sps:$4 sm:$0xff]   ;;  %v2339_v51 = vld [vmem:[#allocation5 + $0x36c] ss:$16 sps:$4 sm:$0xff]  }
  0x69   :  { %1272 = vmatpush1.bf16.msra.mxu0 %v2248_v52  ;;  %1395 = vmatpush1.bf16.msra.mxu1 %v2249_v53  ;;  %v2334_v52 = vld [vmem:[#allocation5 + $0x360] ss:$16 sps:$4 sm:$0xff]   ;;  %v2337_v53 = vld [vmem:[#allocation5 + $0x368] ss:$16 sps:$4 sm:$0xff]  }
  0x6a   :  { %1273 = vmatprep.subr.bf16.mxu0 %v2250_v54  ;;  %1396 = vmatprep.subr.bf16.mxu1 %v2252_v55  ;;  %v2342_v54 = vld [vmem:[#allocation5 + $0x384] ss:$16 sps:$4 sm:$0xff]   ;;  %v2345_v55 = vld [vmem:[#allocation5 + $0x38c] ss:$16 sps:$4 sm:$0xff]  }
  0x6d   :  { %1274 = vmatpush1.bf16.msra.mxu0 %v2254_v56  ;;  %1397 = vmatpush1.bf16.msra.mxu1 %v2255_v57  ;;  %v2340_v56 = vld [vmem:[#allocation5 + $0x380] ss:$16 sps:$4 sm:$0xff]   ;;  %v2343_v57 = vld [vmem:[#allocation5 + $0x388] ss:$16 sps:$4 sm:$0xff]  }
  0x6e   :  { %1275 = vmatprep.subr.bf16.mxu0 %v2256_v58  ;;  %1398 = vmatprep.subr.bf16.mxu1 %v2258_v59  ;;  %v2348_v58 = vld [vmem:[#allocation5 + $0x3a4] ss:$16 sps:$4 sm:$0xff]   ;;  %v2351_v59 = vld [vmem:[#allocation5 + $0x3ac] ss:$16 sps:$4 sm:$0xff]  }
  0x71   :  { %1276 = vmatpush1.bf16.msra.mxu0 %v2260_v60  ;;  %1399 = vmatpush1.bf16.msra.mxu1 %v2261_v61  ;;  %v2346_v60 = vld [vmem:[#allocation5 + $0x3a0] ss:$16 sps:$4 sm:$0xff]   ;;  %v2349_v61 = vld [vmem:[#allocation5 + $0x3a8] ss:$16 sps:$4 sm:$0xff]  }
  0x72   :  { %1277 = vmatprep.subr.bf16.mxu0 %v2262_v62  ;;  %1400 = vmatprep.subr.bf16.mxu1 %v2264_v63  ;;  %v2354_v62 = vld [vmem:[#allocation5 + $0x3c4] ss:$16 sps:$4 sm:$0xff]   ;;  %v2357_v63 = vld [vmem:[#allocation5 + $0x3cc] ss:$16 sps:$4 sm:$0xff]  }
  0x75   :  { %1278 = vmatpush1.bf16.msra.mxu0 %v2266_v0  ;;  %1401 = vmatpush1.bf16.msra.mxu1 %v2267_v1  ;;  %v2352_v0 = vld [vmem:[#allocation5 + $0x3c0] ss:$16 sps:$4 sm:$0xff]   ;;  %v2355_v1 = vld [vmem:[#allocation5 + $0x3c8] ss:$16 sps:$4 sm:$0xff]  }
  0x76   :  { %1288 = vmatprep.subr.bf16.mxu0 %v2270_v3  ;;  %1411 = vmatprep.subr.bf16.mxu1 %v2273_v4  ;;  %v2363_v3 = vld [vmem:[#allocation5 + $0x3ec] ss:$16 sps:$4 sm:$0xff]   ;;  %v2358_v4 = vld [vmem:[#allocation5 + $0x3e0] ss:$16 sps:$4 sm:$0xff]  }
  0x78   :  { %1280 = vmatmul.mubr.bf16.vlgmr.msra.gmra.mrb[0].mxu0 %v67_v5  ;;  %1403 = vmatmul.mubr.bf16.vlgmr.msra.gmra.mrb[0].mxu1 %v67_v5  ;;  %v2361_v5 = vld [vmem:[#allocation5 + $0x3e8] ss:$16 sps:$4 sm:$0xff]  }
  0x79   :  { %1289 = vmatpush1.bf16.msra.mxu0 %v2268_v6  ;;  %1412 = vmatpush1.bf16.msra.mxu1 %v2271_v7  ;;  %v2366_v6 = vld [vmem:[#allocation5 + $0x404] ss:$16 sps:$4 sm:$0xff]  }
  0x7a   :  { %1290 = vmatprep.subr.bf16.mxu0 %v2276_v8  ;;  %1413 = vmatprep.subr.bf16.mxu1 %v2279_v9  ;;  %v63_v7 = vld [vmem:[#allocation2 + $0x10] sm:$0xff]  ;;  %v2369_v8 = vld [vmem:[#allocation5 + $0x40c] ss:$16 sps:$4 sm:$0xff]  }
  0x7b   :  { %1320 = vmatprep.mubr.bf16.mxu0 %v70_v32  ;;  %1443 = vmatprep.mubr.bf16.mxu1 %v70_v32  ;;  %v2364_v9 = vld [vmem:[#allocation5 + $0x400] ss:$16 sps:$4 sm:$0xff]  }
  0x7c   :  { %v2394_v32 = vld [vmem:[#allocation5 + $0x4a0] ss:$16 sps:$4 sm:$0xff]  }
  0x7d   :  { %1291 = vmatpush1.bf16.msra.mxu0 %v2274_v10  ;;  %1414 = vmatpush1.bf16.msra.mxu1 %v2277_v11  ;;  %v69_v10 = vpack.c.bf16 %v63_v7, %v63_v7  ;;  %v2367_v11 = vld [vmem:[#allocation5 + $0x408] ss:$16 sps:$4 sm:$0xff]   ;;  %v2459_v7 = vld [vmem:[#allocation5 + $0x5ec] ss:$16 sps:$4 sm:$0xff]  }
  0x7e   :  { %1292 = vmatprep.subr.bf16.mxu0 %v2282_v12  ;;  %1415 = vmatprep.subr.bf16.mxu1 %v2285_v13  ;;  %v2372_v12 = vld [vmem:[#allocation5 + $0x424] ss:$16 sps:$4 sm:$0xff]   ;;  %v2375_v13 = vld [vmem:[#allocation5 + $0x42c] ss:$16 sps:$4 sm:$0xff]  }
  0x81   :  { %1293 = vmatpush1.bf16.msra.mxu0 %v2280_v14  ;;  %1416 = vmatpush1.bf16.msra.mxu1 %v2283_v15  ;;  %v66_v14 = vld [vmem:[#allocation2 + $0x28] sm:$0xff]  ;;  %v2370_v15 = vld [vmem:[#allocation5 + $0x420] ss:$16 sps:$4 sm:$0xff]  }
  0x82   :  { %1294 = vmatprep.subr.bf16.mxu0 %v2288_v16  ;;  %1417 = vmatprep.subr.bf16.mxu1 %v2291_v17  ;;  %v72_v16 = vpack.c.bf16 %v66_v14, %v66_v14  ;;  %v2373_v17 = vld [vmem:[#allocation5 + $0x428] ss:$16 sps:$4 sm:$0xff]   ;;  %v2462_v14 = vld [vmem:[#allocation7] sm:$0xff]  }
  0x85   :  { %1295 = vmatpush1.bf16.msra.mxu0 %v2286_v18  ;;  %1418 = vmatpush1.bf16.msra.mxu1 %v2289_v19  ;;  %v2378_v18 = vld [vmem:[#allocation5 + $0x444] ss:$16 sps:$4 sm:$0xff]   ;;  %v2381_v19 = vld [vmem:[#allocation5 + $0x44c] ss:$16 sps:$4 sm:$0xff]  }
  0x86   :  { %1296 = vmatprep.subr.bf16.mxu0 %v2294_v20  ;;  %1419 = vmatprep.subr.bf16.mxu1 %v2297_v21  ;;  %v2376_v20 = vld [vmem:[#allocation5 + $0x440] ss:$16 sps:$4 sm:$0xff]   ;;  %v2379_v21 = vld [vmem:[#allocation5 + $0x448] ss:$16 sps:$4 sm:$0xff]  }
  0x89   :  { %1297 = vmatpush1.bf16.msra.mxu0 %v2292_v22  ;;  %1420 = vmatpush1.bf16.msra.mxu1 %v2295_v23  ;;  %v2384_v22 = vld [vmem:[#allocation5 + $0x464] ss:$16 sps:$4 sm:$0xff]   ;;  %v2387_v23 = vld [vmem:[#allocation5 + $0x46c] ss:$16 sps:$4 sm:$0xff]  }
  0x8a   :  { %1298 = vmatprep.subr.bf16.mxu0 %v2300_v24  ;;  %1421 = vmatprep.subr.bf16.mxu1 %v2303_v25  ;;  %v2382_v24 = vld [vmem:[#allocation5 + $0x460] ss:$16 sps:$4 sm:$0xff]   ;;  %v2385_v25 = vld [vmem:[#allocation5 + $0x468] ss:$16 sps:$4 sm:$0xff]  }
  0x8d   :  { %1299 = vmatpush1.bf16.msra.mxu0 %v2298_v26  ;;  %1422 = vmatpush1.bf16.msra.mxu1 %v2301_v27  ;;  %v2390_v26 = vld [vmem:[#allocation5 + $0x484] ss:$16 sps:$4 sm:$0xff]   ;;  %v2393_v27 = vld [vmem:[#allocation5 + $0x48c] ss:$16 sps:$4 sm:$0xff]  }
  0x8e   :  { %1300 = vmatprep.subr.bf16.mxu0 %v2306_v28  ;;  %1423 = vmatprep.subr.bf16.mxu1 %v2309_v29  ;;  %v2388_v28 = vld [vmem:[#allocation5 + $0x480] ss:$16 sps:$4 sm:$0xff]   ;;  %v2391_v29 = vld [vmem:[#allocation5 + $0x488] ss:$16 sps:$4 sm:$0xff]  }
  0x91   :  { %1301 = vmatpush1.bf16.msra.mxu0 %v2304_v31  ;;  %1424 = vmatpush1.bf16.msra.mxu1 %v2307_v33  ;;  %v2399_v31 = vld [vmem:[#allocation5 + $0x4ac] ss:$16 sps:$4 sm:$0xff]   ;;  %v2397_v33 = vld [vmem:[#allocation5 + $0x4a8] ss:$16 sps:$4 sm:$0xff]  }
  0x92   :  { %1302 = vmatprep.subr.bf16.mxu0 %v2312_v34  ;;  %1425 = vmatprep.subr.bf16.mxu1 %v2315_v35  ;;  %v2402_v34 = vld [vmem:[#allocation5 + $0x4c4] ss:$16 sps:$4 sm:$0xff]   ;;  %v2405_v35 = vld [vmem:[#allocation5 + $0x4cc] ss:$16 sps:$4 sm:$0xff]  }
  0x95   :  { %1303 = vmatpush1.bf16.msra.mxu0 %v2310_v36  ;;  %1426 = vmatpush1.bf16.msra.mxu1 %v2313_v37  ;;  %v2400_v36 = vld [vmem:[#allocation5 + $0x4c0] ss:$16 sps:$4 sm:$0xff]   ;;  %v2403_v37 = vld [vmem:[#allocation5 + $0x4c8] ss:$16 sps:$4 sm:$0xff]  }
  0x96   :  { %1304 = vmatprep.subr.bf16.mxu0 %v2318_v38  ;;  %1427 = vmatprep.subr.bf16.mxu1 %v2321_v39  ;;  %v2408_v38 = vld [vmem:[#allocation5 + $0x4e4] ss:$16 sps:$4 sm:$0xff]   ;;  %v2411_v39 = vld [vmem:[#allocation5 + $0x4ec] ss:$16 sps:$4 sm:$0xff]  }
  0x99   :  { %1305 = vmatpush1.bf16.msra.mxu0 %v2316_v40  ;;  %1428 = vmatpush1.bf16.msra.mxu1 %v2319_v41  ;;  %v2406_v40 = vld [vmem:[#allocation5 + $0x4e0] ss:$16 sps:$4 sm:$0xff]   ;;  %v2409_v41 = vld [vmem:[#allocation5 + $0x4e8] ss:$16 sps:$4 sm:$0xff]  }
  0x9a   :  { %1306 = vmatprep.subr.bf16.mxu0 %v2324_v42  ;;  %1429 = vmatprep.subr.bf16.mxu1 %v2327_v43  ;;  %v2414_v42 = vld [vmem:[#allocation5 + $0x504] ss:$16 sps:$4 sm:$0xff]   ;;  %v2417_v43 = vld [vmem:[#allocation5 + $0x50c] ss:$16 sps:$4 sm:$0xff]  }
  0x9d   :  { %1307 = vmatpush1.bf16.msra.mxu0 %v2322_v44  ;;  %1430 = vmatpush1.bf16.msra.mxu1 %v2325_v45  ;;  %v2412_v44 = vld [vmem:[#allocation5 + $0x500] ss:$16 sps:$4 sm:$0xff]   ;;  %v2415_v45 = vld [vmem:[#allocation5 + $0x508] ss:$16 sps:$4 sm:$0xff]  }
  0x9e   :  { %1308 = vmatprep.subr.bf16.mxu0 %v2330_v46  ;;  %1431 = vmatprep.subr.bf16.mxu1 %v2333_v47  ;;  %v2420_v46 = vld [vmem:[#allocation5 + $0x524] ss:$16 sps:$4 sm:$0xff]   ;;  %v2423_v47 = vld [vmem:[#allocation5 + $0x52c] ss:$16 sps:$4 sm:$0xff]  }
  0xa1   :  { %1309 = vmatpush1.bf16.msra.mxu0 %v2328_v48  ;;  %1432 = vmatpush1.bf16.msra.mxu1 %v2331_v49  ;;  %v2418_v48 = vld [vmem:[#allocation5 + $0x520] ss:$16 sps:$4 sm:$0xff]   ;;  %v2421_v49 = vld [vmem:[#allocation5 + $0x528] ss:$16 sps:$4 sm:$0xff]  }
  0xa2   :  { %1310 = vmatprep.subr.bf16.mxu0 %v2336_v50  ;;  %1433 = vmatprep.subr.bf16.mxu1 %v2339_v51  ;;  %v2426_v50 = vld [vmem:[#allocation5 + $0x544] ss:$16 sps:$4 sm:$0xff]   ;;  %v2429_v51 = vld [vmem:[#allocation5 + $0x54c] ss:$16 sps:$4 sm:$0xff]  }
  0xa5   :  { %1311 = vmatpush1.bf16.msra.mxu0 %v2334_v52  ;;  %1434 = vmatpush1.bf16.msra.mxu1 %v2337_v53  ;;  %v2424_v52 = vld [vmem:[#allocation5 + $0x540] ss:$16 sps:$4 sm:$0xff]   ;;  %v2427_v53 = vld [vmem:[#allocation5 + $0x548] ss:$16 sps:$4 sm:$0xff]  }
  0xa6   :  { %1312 = vmatprep.subr.bf16.mxu0 %v2342_v54  ;;  %1435 = vmatprep.subr.bf16.mxu1 %v2345_v55  ;;  %v2432_v54 = vld [vmem:[#allocation5 + $0x564] ss:$16 sps:$4 sm:$0xff]   ;;  %v2435_v55 = vld [vmem:[#allocation5 + $0x56c] ss:$16 sps:$4 sm:$0xff]  }
  0xa9   :  { %1313 = vmatpush1.bf16.msra.mxu0 %v2340_v56  ;;  %1436 = vmatpush1.bf16.msra.mxu1 %v2343_v57  ;;  %v2430_v56 = vld [vmem:[#allocation5 + $0x560] ss:$16 sps:$4 sm:$0xff]   ;;  %v2433_v57 = vld [vmem:[#allocation5 + $0x568] ss:$16 sps:$4 sm:$0xff]  }
  0xaa   :  { %1314 = vmatprep.subr.bf16.mxu0 %v2348_v58  ;;  %1437 = vmatprep.subr.bf16.mxu1 %v2351_v59  ;;  %v2438_v58 = vld [vmem:[#allocation5 + $0x584] ss:$16 sps:$4 sm:$0xff]   ;;  %v2441_v59 = vld [vmem:[#allocation5 + $0x58c] ss:$16 sps:$4 sm:$0xff]  }
  0xad   :  { %1315 = vmatpush1.bf16.msra.mxu0 %v2346_v60  ;;  %1438 = vmatpush1.bf16.msra.mxu1 %v2349_v61  ;;  %v2436_v60 = vld [vmem:[#allocation5 + $0x580] ss:$16 sps:$4 sm:$0xff]   ;;  %v2439_v61 = vld [vmem:[#allocation5 + $0x588] ss:$16 sps:$4 sm:$0xff]  }
  0xae   :  { %1316 = vmatprep.subr.bf16.mxu0 %v2354_v62  ;;  %1439 = vmatprep.subr.bf16.mxu1 %v2357_v63  ;;  %v2444_v62 = vld [vmem:[#allocation5 + $0x5a4] ss:$16 sps:$4 sm:$0xff]   ;;  %v2447_v63 = vld [vmem:[#allocation5 + $0x5ac] ss:$16 sps:$4 sm:$0xff]  }
  0xb1   :  { %1317 = vmatpush1.bf16.msra.mxu0 %v2352_v0  ;;  %1440 = vmatpush1.bf16.msra.mxu1 %v2355_v1  ;;  %v2442_v0 = vld [vmem:[#allocation5 + $0x5a0] ss:$16 sps:$4 sm:$0xff]   ;;  %v2445_v1 = vld [vmem:[#allocation5 + $0x5a8] ss:$16 sps:$4 sm:$0xff]  }
  0xb2   :  { %1318 = vmatprep.subr.bf16.mxu0 %v2360_v2  ;;  %1441 = vmatprep.subr.bf16.mxu1 %v2363_v3  ;;  %v2450_v2 = vld [vmem:[#allocation5 + $0x5c4] ss:$16 sps:$4 sm:$0xff]   ;;  %v2453_v3 = vld [vmem:[#allocation5 + $0x5cc] ss:$16 sps:$4 sm:$0xff]  }
  0xb5   :  { %1319 = vmatpush1.bf16.msra.mxu0 %v2358_v4  ;;  %1442 = vmatpush1.bf16.msra.mxu1 %v2361_v5  ;;  %v2448_v4 = vld [vmem:[#allocation5 + $0x5c0] ss:$16 sps:$4 sm:$0xff]   ;;  %v2451_v5 = vld [vmem:[#allocation5 + $0x5c8] ss:$16 sps:$4 sm:$0xff]  }
  0xb6   :  { %1329 = vmatprep.subr.bf16.mxu0 %v2366_v6  ;;  %1452 = vmatprep.subr.bf16.mxu1 %v2369_v8  ;;  %v2456_v6 = vld [vmem:[#allocation5 + $0x5e4] ss:$16 sps:$4 sm:$0xff]   ;;  %v2454_v8 = vld [vmem:[#allocation5 + $0x5e0] ss:$16 sps:$4 sm:$0xff]  }
  0xb8   :  { %1321 = vmatmul.mubr.bf16.vlgmr.msra.gmra.mrb[0].mxu0 %v69_v10  ;;  %1444 = vmatmul.mubr.bf16.vlgmr.msra.gmra.mrb[0].mxu1 %v69_v10  ;;  %v65_v10 = vld [vmem:[#allocation2 + $0x20] sm:$0xff] }
  0xb9   :  { %1330 = vmatpush1.bf16.msra.mxu0 %v2364_v9  ;;  %1453 = vmatpush1.bf16.msra.mxu1 %v2367_v11  ;;  %v2457_v9 = vld [vmem:[#allocation5 + $0x5e8] ss:$16 sps:$4 sm:$0xff]   ;;  %v2460_v11 = vld [vmem:[#allocation7 + $0x40] sm:$0xff]  }
  0xba   :  { %1331 = vmatprep.subr.bf16.mxu0 %v2372_v12  ;;  %1454 = vmatprep.subr.bf16.mxu1 %v2375_v13  ;;  %v2461_v12 = vld [vmem:[#allocation7 + $0xc0] sm:$0xff]   ;;  %v71_v13 = vpack.c.bf16 %v65_v10, %v65_v10 }
  0xbb   :  { %1361 = vmatprep.mubr.bf16.mxu0 %v72_v16  ;;  %1484 = vmatprep.mubr.bf16.mxu1 %v72_v16  ;;  %v2464_v16 = vld [vmem:[#allocation7 + $0x48] sm:$0xff]  }
  0xbd   :  { %1332 = vmatpush1.bf16.msra.mxu0 %v2370_v15  ;;  %1455 = vmatpush1.bf16.msra.mxu1 %v2373_v17  ;;  %v2463_v15 = vld [vmem:[#allocation7 + $0x80] sm:$0xff]   ;;  %v2465_v17 = vld [vmem:[#allocation7 + $0xc8] sm:$0xff]  }
  0xbe   :  { %1333 = vmatprep.subr.bf16.mxu0 %v2378_v18  ;;  %1456 = vmatprep.subr.bf16.mxu1 %v2381_v19  ;;  %v2466_v18 = vld [vmem:[#allocation7 + $0x8] sm:$0xff]  }
  0xbf   :  { %v2467_v19 = vld [vmem:[#allocation7 + $0x88] sm:$0xff]  }
  0xc1   :  { %1334 = vmatpush1.bf16.msra.mxu0 %v2376_v20  ;;  %1457 = vmatpush1.bf16.msra.mxu1 %v2379_v21  ;;  %v2468_v20 = vld [vmem:[#allocation7 + $0x50] sm:$0xff]  }
  0xc2   :  { %1335 = vmatprep.subr.bf16.mxu0 %v2384_v22  ;;  %1458 = vmatprep.subr.bf16.mxu1 %v2387_v23  ;;  %v2469_v21 = vld [vmem:[#allocation7 + $0xd0] sm:$0xff]  }
  0xc3   :  { %v2470_v22 = vld [vmem:[#allocation7 + $0x10] sm:$0xff]  }
  0xc4   :  { %v2471_v23 = vld [vmem:[#allocation7 + $0x90] sm:$0xff]  }
  0xc5   :  { %1336 = vmatpush1.bf16.msra.mxu0 %v2382_v24  ;;  %1459 = vmatpush1.bf16.msra.mxu1 %v2385_v25  ;;  %v2472_v24 = vld [vmem:[#allocation7 + $0x58] sm:$0xff]  }
  0xc6   :  { %1337 = vmatprep.subr.bf16.mxu0 %v2390_v26  ;;  %1460 = vmatprep.subr.bf16.mxu1 %v2393_v27  ;;  %v2473_v25 = vld [vmem:[#allocation7 + $0xd8] sm:$0xff]  }
  0xc7   :  { %v2474_v26 = vld [vmem:[#allocation7 + $0x18] sm:$0xff]  }
  0xc8   :  { %v2475_v27 = vld [vmem:[#allocation7 + $0x98] sm:$0xff]  }
  0xc9   :  { %1338 = vmatpush1.bf16.msra.mxu0 %v2388_v28  ;;  %1461 = vmatpush1.bf16.msra.mxu1 %v2391_v29  ;;  %v2476_v28 = vld [vmem:[#allocation7 + $0x60] sm:$0xff]  }
  0xca   :  { %1339 = vmatprep.subr.bf16.mxu0 %v2396_v30  ;;  %1462 = vmatprep.subr.bf16.mxu1 %v2399_v31  ;;  %v2477_v29 = vld [vmem:[#allocation7 + $0xe0] sm:$0xff]  }
  0xcb   :  { %v2478_v30 = vld [vmem:[#allocation7 + $0x20] sm:$0xff]  }
  0xcc   :  { %v2479_v31 = vld [vmem:[#allocation7 + $0xa0] sm:$0xff]  }
  0xcd   :  { %1340 = vmatpush1.bf16.msra.mxu0 %v2394_v32  ;;  %1463 = vmatpush1.bf16.msra.mxu1 %v2397_v33  ;;  %v2480_v32 = vld [vmem:[#allocation7 + $0x68] sm:$0xff]  }
  0xce   :  { %1341 = vmatprep.subr.bf16.mxu0 %v2402_v34  ;;  %1464 = vmatprep.subr.bf16.mxu1 %v2405_v35  ;;  %v2481_v33 = vld [vmem:[#allocation7 + $0xe8] sm:$0xff]  }
  0xcf   :  { %v2482_v34 = vld [vmem:[#allocation7 + $0x28] sm:$0xff]  }
  0xd0   :  { %v2483_v35 = vld [vmem:[#allocation7 + $0xa8] sm:$0xff]  }
  0xd1   :  { %1342 = vmatpush1.bf16.msra.mxu0 %v2400_v36  ;;  %1465 = vmatpush1.bf16.msra.mxu1 %v2403_v37  ;;  %v2484_v36 = vld [vmem:[#allocation7 + $0x70] sm:$0xff]  }
  0xd2   :  { %1343 = vmatprep.subr.bf16.mxu0 %v2408_v38  ;;  %1466 = vmatprep.subr.bf16.mxu1 %v2411_v39  ;;  %v2485_v37 = vld [vmem:[#allocation7 + $0xf0] sm:$0xff]  }
  0xd3   :  { %v2486_v38 = vld [vmem:[#allocation7 + $0x30] sm:$0xff]  }
  0xd4   :  { %v2487_v39 = vld [vmem:[#allocation7 + $0xb0] sm:$0xff]  }
  0xd5   :  { %1344 = vmatpush1.bf16.msra.mxu0 %v2406_v40  ;;  %1467 = vmatpush1.bf16.msra.mxu1 %v2409_v41  ;;  %v2488_v40 = vld [vmem:[#allocation7 + $0x78] sm:$0xff]  }
  0xd6   :  { %1345 = vmatprep.subr.bf16.mxu0 %v2414_v42  ;;  %1468 = vmatprep.subr.bf16.mxu1 %v2417_v43  ;;  %v2489_v41 = vld [vmem:[#allocation7 + $0xf8] sm:$0xff]  }
  0xd7   :  { %v2490_v42 = vld [vmem:[#allocation7 + $0x38] sm:$0xff]  }
  0xd8   :  { %v2491_v43 = vld [vmem:[#allocation7 + $0xb8] sm:$0xff]  }
  0xd9   :  { %1346 = vmatpush1.bf16.msra.mxu0 %v2412_v44  ;;  %1469 = vmatpush1.bf16.msra.mxu1 %v2415_v45  ;;  %v267_v44 = vlaneseq }
  0xda   :  { %1347 = vmatprep.subr.bf16.mxu0 %v2420_v46  ;;  %1470 = vmatprep.subr.bf16.mxu1 %v2423_v47 }
  0xdb   :  { %v268_v45 = vshrl.u32 %v267_v44, 7 }
  0xdd   :  { %1348 = vmatpush1.bf16.msra.mxu0 %v2418_v48  ;;  %1471 = vmatpush1.bf16.msra.mxu1 %v2421_v49  ;;  %v269_v46 = vsub.s32 0, %v268_v45  ;;  %v277_v47 = vsub.s32 2, %v268_v45  ;;  %v265_v48 = vld [vmem:[%s2684_s2] sm:$0xf]  ;;  %v273_v49 = vsub.s32 1, %v268_v45 }
  0xde   :  { %1349 = vmatprep.subr.bf16.mxu0 %v2426_v50  ;;  %1472 = vmatprep.subr.bf16.mxu1 %v2429_v51  ;;  %v281_v50 = vsub.s32 3, %v268_v45 }
  0xdf   :  { %v270_v51 = vrot.slane %v265_v48, %v269_v46 }
  0xe1   :  { %1350 = vmatpush1.bf16.msra.mxu0 %v2424_v52  ;;  %1473 = vmatpush1.bf16.msra.mxu1 %v2427_v53  ;;  %v278_v52 = vrot.slane %v265_v48, %v277_v47  ;;  %v274_v53 = vrot.slane %v265_v48, %v273_v49 }
  0xe2   :  { %1351 = vmatprep.subr.bf16.mxu0 %v2432_v54  ;;  %1474 = vmatprep.subr.bf16.mxu1 %v2435_v55  ;;  %v282_v54 = vrot.slane %v265_v48, %v281_v50 }
  0xe5   :  { %1352 = vmatpush1.bf16.msra.mxu0 %v2430_v56  ;;  %1475 = vmatpush1.bf16.msra.mxu1 %v2433_v57 }
  0xe6   :  { %1353 = vmatprep.subr.bf16.mxu0 %v2438_v58  ;;  %1476 = vmatprep.subr.bf16.mxu1 %v2441_v59 }
  0xe9   :  { %1354 = vmatpush1.bf16.msra.mxu0 %v2436_v60  ;;  %1477 = vmatpush1.bf16.msra.mxu1 %v2439_v61 }
  0xea   :  { %1355 = vmatprep.subr.bf16.mxu0 %v2444_v62  ;;  %1478 = vmatprep.subr.bf16.mxu1 %v2447_v63 }
  0xed   :  { %1356 = vmatpush1.bf16.msra.mxu0 %v2442_v0  ;;  %1479 = vmatpush1.bf16.msra.mxu1 %v2445_v1 }
  0xee   :  { %1357 = vmatprep.subr.bf16.mxu0 %v2450_v2  ;;  %1480 = vmatprep.subr.bf16.mxu1 %v2453_v3 }
  0xf1   :  { %1358 = vmatpush1.bf16.msra.mxu0 %v2448_v4  ;;  %1481 = vmatpush1.bf16.msra.mxu1 %v2451_v5 }
  0xf2   :  { %1359 = vmatprep.subr.bf16.mxu0 %v2456_v6  ;;  %1482 = vmatprep.subr.bf16.mxu1 %v2459_v7 }
  0xf5   :  { %1360 = vmatpush1.bf16.msra.mxu0 %v2454_v8  ;;  %1483 = vmatpush1.bf16.msra.mxu1 %v2457_v9 }
  0xf6   :  { %2100 = vmatprep.subr.bf16.mxu0 %v2460_v11  ;;  %2122 = vmatprep.subr.bf16.mxu1 %v2461_v12 }
  0xf8   :  { %1362 = vmatmul.mubr.bf16.vlgmr.msra.gmra.mrb[0].mxu0 %v71_v13  ;;  %1485 = vmatmul.mubr.bf16.vlgmr.msra.gmra.mrb[0].mxu1 %v71_v13  ;;  %v2067_v13 = vld [vmem:[%s2686_s4] ss:$0 sm:$0xff]  ;;  %s2597_s4 = smov [#allocation8]  }
  0xf9   :  { %2101 = vmatpush3.bf16.msra.mxu0 %v2462_v14  ;;  %2123 = vmatpush3.bf16.msra.mxu1 %v2463_v15  ;;  %s1865_s8 = sshll.u32 %s2597_s4, 4  ;;  %s1866_s8 = int_to_ptr.vmem [resolvable:$true] %s1865_s8 }
  0xfa   :  { %2102 = vmatprep.subr.bf16.mxu0 %v2464_v16  ;;  %2124 = vmatprep.subr.bf16.mxu1 %v2465_v17  ;;  %v1845_v16 = vand.u32 127, %v267_v44  ;;  %s2562_s9 = scalar_lea.vmem %s1866_s8, 128  ;;  %p2567_p11 = scmp.lt.s32.totalorder %s1866_s8, %s1866_s8 }
  0xfb   :  { %p2563_p10 = scmp.ne.s32.totalorder %s1866_s8, %s2562_s9  ;;  %p2568_p12 = scmp.lt.s32.totalorder %s2562_s9, %s2562_s9 }
  0xfc   :  { %vm1846_vm0 = vcmp.lt.s32.totalorder %v1845_v16, 2 }
  0xfd   :  { %2103 = vmatpush3.bf16.msra.mxu0 %v2466_v18  ;;  %2125 = vmatpush3.bf16.msra.mxu1 %v2467_v19  ;;  %p2569_p13 = por %p2568_p12, %p2567_p11 }
  0xfe   :  { %2104 = vmatprep.subr.bf16.mxu0 %v2468_v20  ;;  %2126 = vmatprep.subr.bf16.mxu1 %v2469_v21 }
  0xff   :  { %p2570_p0 = pnand %p2569_p13, %p2563_p10 }
 0x101   :  { %2105 = vmatpush3.bf16.msra.mxu0 %v2470_v22  ;;  %2127 = vmatpush3.bf16.msra.mxu1 %v2471_v23 }
 0x102   :  { %2106 = vmatprep.subr.bf16.mxu0 %v2472_v24  ;;  %2128 = vmatprep.subr.bf16.mxu1 %v2473_v25 }
 0x105   :  { %2107 = vmatpush3.bf16.msra.mxu0 %v2474_v26  ;;  %2129 = vmatpush3.bf16.msra.mxu1 %v2475_v27 }
 0x106   :  { %2108 = vmatprep.subr.bf16.mxu0 %v2476_v28  ;;  %2130 = vmatprep.subr.bf16.mxu1 %v2477_v29 }
 0x109   :  { %2109 = vmatpush3.bf16.msra.mxu0 %v2478_v30  ;;  %2131 = vmatpush3.bf16.msra.mxu1 %v2479_v31 }
 0x10a   :  { %2110 = vmatprep.subr.bf16.mxu0 %v2480_v32  ;;  %2132 = vmatprep.subr.bf16.mxu1 %v2481_v33 }
 0x10d   :  { %2111 = vmatpush3.bf16.msra.mxu0 %v2482_v34  ;;  %2133 = vmatpush3.bf16.msra.mxu1 %v2483_v35 }
 0x10e   :  { %2112 = vmatprep.subr.bf16.mxu0 %v2484_v36  ;;  %2134 = vmatprep.subr.bf16.mxu1 %v2485_v37 }
 0x111   :  { %2113 = vmatpush3.bf16.msra.mxu0 %v2486_v38  ;;  %2135 = vmatpush3.bf16.msra.mxu1 %v2487_v39 }
 0x112   :  { %2114 = vmatprep.subr.bf16.mxu0 %v2488_v40  ;;  %2136 = vmatprep.subr.bf16.mxu1 %v2489_v41 }
 0x115   :  { %2115 = vmatpush3.bf16.msra.mxu0 %v2490_v42  ;;  %2137 = vmatpush3.bf16.msra.mxu1 %v2491_v43 }
 0x1cb   :  { %v1363_v55 = vpop.f32.mrb[0].mxu0  ;;  %v1486_v56 = vpop.f32.mrb[0].mxu1 }
 0x1cc   :  { %v2144_v57 = vadd.f32 %v1363_v55, %v270_v51  ;;  %v2146_v58 = vadd.f32 %v1486_v56, %v278_v52  ;;  %v1365_v59 = vpop.f32.mrb[1].mxu0  ;;  %v1488_v60 = vpop.f32.mrb[1].mxu1 }
 0x1cd   :  { %v2145_v61 = vadd.f32 %v1365_v59, %v274_v53  ;;  %v2147_v62 = vadd.f32 %v1488_v60, %v282_v54  ;;  %v1367_v63 = vpop.f32.mrb[2].mxu0  ;;  %v1490_v0 = vpop.f32.mrb[2].mxu1 }
 0x1ce   :  { %v1493_v1 = vmax.f32 %v2144_v57, 0.0  ;;  %v1495_v2 = vmax.f32 %v2146_v58, 0.0  ;;  %v1368_v3 = vpop.f32.mrb[3].mxu0  ;;  %v1491_v4 = vpop.f32.mrb[3].mxu1 }
 0x1cf   :  { %v1494_v5 = vmax.f32 %v2145_v61, 0.0  ;;  %v1496_v6 = vmax.f32 %v2147_v62, 0.0 }
 0x1d0   :  { %v1497_v9 = vpack.c.bf16 %v1493_v1, %v1493_v1  ;;  %v1499_v10 = vpack.c.bf16 %v1495_v2, %v1495_v2 }
 0x1d1   :  { %v1498_v7 = vpack.c.bf16 %v1494_v5, %v1494_v5  ;;  %v1500_v8 = vpack.c.bf16 %v1496_v6, %v1496_v6 }
 0x1d3   :  { %1796 = vmatprep.mubr.bf16.mxu0 %v1498_v7  ;;  %1836 = vmatprep.mubr.bf16.mxu1 %v1500_v8 }
 0x1d4   :  { %1797 = vmatmul.mubr.bf16.vlgmr.msra.gmra.mrb[4].mxu0 %v1497_v9  ;;  %1837 = vmatmul.mubr.bf16.vlgmr.msra.gmra.mrb[4].mxu1 %v1499_v10 }
 0x2a7   :  { %v2116_v11 = vpop.f32.mrb[4].mxu0  ;;  %v2138_v12 = vpop.f32.mrb[4].mxu1 }
 0x2a8   :  { %v2117_v14 = vpop.f32.mrb[5].mxu0  ;;  %v2139_v15 = vpop.f32.mrb[5].mxu1 }
 0x2a9   :  { %v2118_v17 = vadd.f32 %v2117_v14, %v2116_v11  ;;  %v2140_v18 = vadd.f32 %v2139_v15, %v2138_v12  ;;  %v2119_v19 = vpop.f32.mrb[6].mxu0  ;;  %v2141_v20 = vpop.f32.mrb[6].mxu1 }
 0x2aa   :  { %v2120_v21 = vpop.f32.mrb[7].mxu0  ;;  %v2142_v22 = vpop.f32.mrb[7].mxu1 }
 0x2ab   :  { %v1799_v23 = vadd.f32 %v2118_v17, %v2067_v13 }
 0x2ad   :  { %v1839_v24 = vadd.f32 %v2140_v18, %v1799_v23 }
 0x2af   :  { %v1847_v25 = vsel %vm1846_vm0, %v1839_v24, -1e+30 }
 0x2b0   :  { %1848 = vmax.xlane.f32.xlu0 %v1847_v25 }
 0x33d   :  { %v1849_v26 = vpop.xlane.xlu0 %1848 }
 0x33e   :  { %v1850_v27 = vsub.f32 %v1847_v25, %v1849_v26 }
 0x340   :  { %v1851_v28 = vmul.f32 1.442695, %v1850_v27 }
 0x342   :  { %2492 = vpow2.f32 %v1851_v28 }
 0x34c   :  { %v2493_v29 = vpop.eup %2492 }
 0x34d   :  { %1853 = vadd.xlane.f32.xlu0 %v2493_v29 }
 0x3da   :  { %v1854_v30 = vpop.xlane.xlu0 %1853 }
 0x3db   :  { %2494 = vlog2.f32 %v1854_v30 }
 0x3e5   :  { %v2495_v31 = vpop.eup %2494 }
 0x3e6   :  { %v1856_v32 = vmul.f32 0.6931472, %v2495_v31 }
 0x3e8   :  { %v1857_v33 = vsub.f32 %v1850_v27, %v1856_v32 }
 0x3ea   :  { %1858 = vst [vmem:[#allocation8] sm:$0xff] %v1857_v33 }
 0x3eb   :  { %2573 = shalt.err (!%p2570_p0)
}
 0x3ec   :  { %s2574_s12 = scalar_lea.hbm %s2687_s5, 128 }
 0x3ed   :  { %p2575_p1 = scmp.ne.s32.totalorder %s2687_s5, %s2574_s12  ;;  %p2578_p2 = scmp.lt.u32.totalorder %s2574_s12, %s2687_s5 }
 0x3ef   :  { %p2580_p3 = pnand %p2578_p2, %p2575_p1 }
 0x3f1   :  { %2583 = shalt.err (!%p2580_p3)
}
 0x3f2   :  { %1868 = dma.vmem_to_hbm [thread:$0]  %s1866_s8, 128, %s2687_s5, [#allocation4]  }
 0x3f3   :  { %2588 = dma.done.wait [#allocation4], 128  }
 0x3f4   :  { %2589 = vsyncadd [#allocation4], 4294967168 }
 0x3f5   :  { %1872 = vsyncpa [#allocation3], 1 }
 0x3f6   :  { %1873 = vsyncpa [#allocation6], 1 }
 0x3f7   :  { %1874 = vsyncpa [#allocation4], 1 }

</bundles_post_ra>
